<compile_context>
chip_gen: v7x
topology: tpu7x:2x2x1
jax: 0.10.0
libtpu: 0.0.40
codegen_flags: <defaults>
</compile_context>

<pallas_src>
import jax
import jax.numpy as jnp
from jax.experimental import pallas as pl
from jax.experimental.pallas import tpu as pltpu

PAD = 128          # lane-dense padding for the narrow hidden/output dims
D_IN = 512
D_H1 = 512
D_OUT = 2
MAX_TB = 1024      # batch-tile cap (f32 x-tile double-buffered: 4 MiB)


def _round_up(n, m):
    return ((n + m - 1) // m) * m


def _mlp_kernel(x_ref, w1_ref, b1_ref, w2_ref, b2_ref, w3_ref, b3_ref, o_ref):
    # x tile arrives as f32 straight from HBM; cast to bf16 for the MXU here
    # (VPU work, hidden under the fc1 matmul / next-tile DMA).
    x = x_ref[...].astype(jnp.bfloat16)
    # fc1 + ReLU : (TB,512)bf16 @ (512,512)bf16 -> f32, + (1,512)f32
    h1 = jnp.dot(x, w1_ref[...], preferred_element_type=jnp.float32)
    h1 = jnp.maximum(h1 + b1_ref[...], 0.0)
    # fc2 + ReLU : (TB,512)bf16 @ (512,128pad)bf16 -> f32   (real width 10)
    h2 = jnp.dot(h1.astype(jnp.bfloat16), w2_ref[...],
                 preferred_element_type=jnp.float32)
    h2 = jnp.maximum(h2 + b2_ref[...], 0.0)
    # fc3        : (TB,128pad)bf16 @ (128pad,128pad)bf16 -> f32 (real width 2)
    out = jnp.dot(h2.astype(jnp.bfloat16), w3_ref[...],
                  preferred_element_type=jnp.float32)
    out = out + b3_ref[...]
    # Only the first D_OUT lanes are real -> masked store of the (TB, 2) block.
    o_ref[...] = out[:, :D_OUT].astype(o_ref.dtype)


def prepare_params(params):
    """One-time prep (outside the hot path): pad narrow layers to 128 lanes,
    cast weights to bf16, keep biases in f32. Zero padding keeps padded lanes
    exactly 0 through the ReLUs, so real outputs are uncontaminated."""
    w1, b1, w2, b2, w3, b3 = params
    w1p = w1.astype(jnp.bfloat16)                                   # (512,512)
    b1p = b1.reshape(1, -1).astype(jnp.float32)                     # (1,512)
    w2p = jnp.zeros((D_H1, PAD), jnp.bfloat16).at[:, : w2.shape[1]].set(
        w2.astype(jnp.bfloat16))                                    # (512,128)
    b2p = jnp.zeros((1, PAD), jnp.float32).at[:, : b2.shape[0]].set(b2)
    w3p = jnp.zeros((PAD, PAD), jnp.bfloat16).at[: w3.shape[0], : w3.shape[1]].set(
        w3.astype(jnp.bfloat16))                                    # (128,128)
    b3p = jnp.zeros((1, PAD), jnp.float32).at[:, : b3.shape[0]].set(b3)
    return (w1p, b1p, w2p, b2p, w3p, b3p)


@jax.jit
def simple_nn_forward(x, prepared):
    """x: (B, 512) float32. prepared: output of prepare_params. -> (B, 2) f32."""
    w1p, b1p, w2p, b2p, w3p, b3p = prepared
    B = x.shape[0]

    # Batch tile: multiple of 8 sublanes; ~ceil(B/2) so the grid has >=2 steps
    # whenever possible (both v7x TensorCores busy), capped at MAX_TB to bound
    # VMEM and amortize per-step overhead at large B.
    TB = min(MAX_TB, _round_up(max(1, -(-B // 2)), 8))
    grid = (pl.cdiv(B, TB),)

    const = lambda shape: pl.BlockSpec(shape, lambda i: (0, 0))

    flops = 2 * B * (D_IN * D_H1 + D_H1 * PAD + PAD * PAD)
    bytes_accessed = (
        B * D_IN * 4 + B * D_OUT * 4                  # x in (f32), out (f32, width 2)
        + (D_IN * D_H1 + D_H1 * PAD + PAD * PAD) * 2  # weights (bf16)
        + (D_H1 + PAD + PAD) * 4                      # biases (f32)
    )

    out = pl.pallas_call(
        _mlp_kernel,
        out_shape=jax.ShapeDtypeStruct((B, D_OUT), jnp.float32),
        grid=grid,
        in_specs=[
            pl.BlockSpec((TB, D_IN), lambda i: (i, 0)),   # x (batch-tiled, f32)
            const((D_H1, D_H1)),                          # w1   (resident)
            const((1, D_H1)),                             # b1
            const((D_H1, PAD)),                           # w2 (padded)
            const((1, PAD)),                              # b2 (padded)
            const((PAD, PAD)),                            # w3 (padded)
            const((1, PAD)),                              # b3 (padded)
        ],
        out_specs=pl.BlockSpec((TB, D_OUT), lambda i: (i, 0)),
        compiler_params=pltpu.CompilerParams(
            dimension_semantics=("parallel",),
            vmem_limit_bytes=32 << 20,
        ),
        cost_estimate=pl.CostEstimate(
            flops=flops, transcendentals=0, bytes_accessed=bytes_accessed),
    )(x, w1p, b1p, w2p, b2p, w3p, b3p)

    return out


def init_params(key):
    """Deterministic init matching nn.Linear shapes (stored as (in, out))."""
    k1, k2, k3, k4, k5, k6 = jax.random.split(key, 6)

    def uinit(k, shape, fan_in):
        bound = 1.0 / jnp.sqrt(fan_in)
        return jax.random.uniform(k, shape, jnp.float32, -bound, bound)

    w1 = uinit(k1, (512, 512), 512)   # fc1.weight.T
    b1 = uinit(k2, (512,), 512)
    w2 = uinit(k3, (512, 10), 512)    # fc2.weight.T
    b2 = uinit(k4, (10,), 512)
    w3 = uinit(k5, (10, 2), 10)       # fc3.weight.T
    b3 = uinit(k6, (2,), 10)
    return (w1, b1, w2, b2, w3, b3)


def _reference_f32(x, params):
    w1, b1, w2, b2, w3, b3 = params
    h = jnp.maximum(x @ w1 + b1, 0.0)
    h = jnp.maximum(h @ w2 + b2, 0.0)
    return h @ w3 + b3


def _reference_bf16(x, params):
    """Same bf16-input / f32-accumulate numerics as the kernel."""
    w1, b1, w2, b2, w3, b3 = params
    bf = jnp.bfloat16
    dot = lambda a, b: jnp.dot(a.astype(bf), b.astype(bf),
                               preferred_element_type=jnp.float32)
    h = jnp.maximum(dot(x, w1) + b1, 0.0)
    h = jnp.maximum(dot(h, w2) + b2, 0.0)
    return dot(h, w3) + b3


if __name__ == "__main__":
    key = jax.random.PRNGKey(0)
    k_param, k_x = jax.random.split(key)
    params = init_params(k_param)
    prepared = prepare_params(params)

    # B=8: aligned case. B=13: exercises the ragged/partial last batch tile
    # (no explicit zero-pad pass anymore; Pallas masks the tail on writeback).
    for B in (8, 13):
        x = jax.random.normal(jax.random.fold_in(k_x, B), (B, 512), jnp.float32)
        out = jax.block_until_ready(simple_nn_forward(x, prepared))
        assert out.shape == (B, 2), out.shape
        # Exact-numerics check vs a bf16-input / f32-accumulate reference.
        ref_bf16 = _reference_bf16(x, params)
        assert jnp.allclose(out, ref_bf16, atol=2e-3, rtol=2e-3), \
            f"mismatch vs bf16 reference (B={B})"
        # Sanity check vs the full-f32 reference (loose tol due to bf16 matmuls).
        ref_f32 = _reference_f32(x, params)
        assert jnp.allclose(out, ref_f32, atol=5e-2, rtol=5e-2), \
            f"mismatch vs f32 reference (B={B})"

    print("KERNEL_OK")
</pallas_src>

<mosaic_0001>
module attributes {stable_mosaic.version = 11 : i64} {
  func.func @_mlp_kernel(%arg0: i32, %arg1: memref<8x512xf32, #tpu.memory_space<vmem>>, %arg2: memref<512x512xbf16, #tpu.memory_space<vmem>>, %arg3: memref<1x512xf32, #tpu.memory_space<vmem>>, %arg4: memref<512x128xbf16, #tpu.memory_space<vmem>>, %arg5: memref<1x128xf32, #tpu.memory_space<vmem>>, %arg6: memref<128x128xbf16, #tpu.memory_space<vmem>>, %arg7: memref<1x128xf32, #tpu.memory_space<vmem>>, %arg8: memref<8x2xf32, #tpu.memory_space<vmem>>) attributes {dimension_semantics = [#tpu.dimension_semantics<parallel>], iteration_bounds = array<i64: 1>, scalar_prefetch = 0 : i64, scratch_operands = 0 : i64, tpu.core_type = #tpu.core_type<tc>, window_params = [{transform_indices = @transform_0, window_bounds = array<i64: 8, 512>}, {pipeline_mode = #tpu.pipeline_mode<synchronous>, transform_indices = @transform_1, window_bounds = array<i64: 512, 512>}, {pipeline_mode = #tpu.pipeline_mode<synchronous>, transform_indices = @transform_2, window_bounds = array<i64: 1, 512>}, {pipeline_mode = #tpu.pipeline_mode<synchronous>, transform_indices = @transform_3, window_bounds = array<i64: 512, 128>}, {pipeline_mode = #tpu.pipeline_mode<synchronous>, transform_indices = @transform_4, window_bounds = array<i64: 1, 128>}, {pipeline_mode = #tpu.pipeline_mode<synchronous>, transform_indices = @transform_5, window_bounds = array<i64: 128, 128>}, {pipeline_mode = #tpu.pipeline_mode<synchronous>, transform_indices = @transform_6, window_bounds = array<i64: 1, 128>}, {transform_indices = @transform_7, window_bounds = array<i64: 8, 2>}]} {
    %c0 = arith.constant 0 : index
    %c0_0 = arith.constant 0 : index
    %0 = vector.load %arg1[%c0, %c0_0] : memref<8x512xf32, #tpu.memory_space<vmem>>, vector<8x512xf32>
    %1 = arith.truncf %0 : vector<8x512xf32> to vector<8x512xbf16>
    %c0_1 = arith.constant 0 : index
    %c0_2 = arith.constant 0 : index
    %2 = vector.load %arg2[%c0_1, %c0_2] : memref<512x512xbf16, #tpu.memory_space<vmem>>, vector<512x512xbf16>
    %cst = arith.constant dense<0.000000e+00> : vector<8x512xf32>
    %3 = tpu.matmul %1, %2, %cst {dimension_numbers = #tpu.dot_dimension_numbers<[1], [0], [0], [1], [0, 0, 1, 1], [], []>} : vector<8x512xbf16>, vector<512x512xbf16>, vector<8x512xf32> -> vector<8x512xf32>
    %c0_3 = arith.constant 0 : index
    %c0_4 = arith.constant 0 : index
    %4 = vector.load %arg3[%c0_3, %c0_4] : memref<1x512xf32, #tpu.memory_space<vmem>>, vector<1x512xf32>
    %5 = vector.broadcast %4 : vector<1x512xf32> to vector<8x512xf32>
    %6 = arith.addf %3, %5 : vector<8x512xf32>
    %cst_5 = arith.constant 0.000000e+00 : f32
    %7 = vector.broadcast %cst_5 : f32 to vector<8x512xf32>
    %8 = arith.maximumf %6, %7 : vector<8x512xf32>
    %9 = arith.truncf %8 : vector<8x512xf32> to vector<8x512xbf16>
    %c0_6 = arith.constant 0 : index
    %c0_7 = arith.constant 0 : index
    %10 = vector.load %arg4[%c0_6, %c0_7] : memref<512x128xbf16, #tpu.memory_space<vmem>>, vector<512x128xbf16>
    %cst_8 = arith.constant dense<0.000000e+00> : vector<8x128xf32>
    %11 = tpu.matmul %9, %10, %cst_8 {dimension_numbers = #tpu.dot_dimension_numbers<[1], [0], [0], [1], [0, 0, 1, 1], [], []>} : vector<8x512xbf16>, vector<512x128xbf16>, vector<8x128xf32> -> vector<8x128xf32>
    %c0_9 = arith.constant 0 : index
    %c0_10 = arith.constant 0 : index
    %12 = vector.load %arg5[%c0_9, %c0_10] : memref<1x128xf32, #tpu.memory_space<vmem>>, vector<1x128xf32>
    %13 = vector.broadcast %12 : vector<1x128xf32> to vector<8x128xf32>
    %14 = arith.addf %11, %13 : vector<8x128xf32>
    %cst_11 = arith.constant 0.000000e+00 : f32
    %15 = vector.broadcast %cst_11 : f32 to vector<8x128xf32>
    %16 = arith.maximumf %14, %15 : vector<8x128xf32>
    %17 = arith.truncf %16 : vector<8x128xf32> to vector<8x128xbf16>
    %c0_12 = arith.constant 0 : index
    %c0_13 = arith.constant 0 : index
    %18 = vector.load %arg6[%c0_12, %c0_13] : memref<128x128xbf16, #tpu.memory_space<vmem>>, vector<128x128xbf16>
    %cst_14 = arith.constant dense<0.000000e+00> : vector<8x128xf32>
    %19 = tpu.matmul %17, %18, %cst_14 {dimension_numbers = #tpu.dot_dimension_numbers<[1], [0], [0], [1], [0, 0, 1, 1], [], []>} : vector<8x128xbf16>, vector<128x128xbf16>, vector<8x128xf32> -> vector<8x128xf32>
    %c0_15 = arith.constant 0 : index
    %c0_16 = arith.constant 0 : index
    %20 = vector.load %arg7[%c0_15, %c0_16] : memref<1x128xf32, #tpu.memory_space<vmem>>, vector<1x128xf32>
    %21 = vector.broadcast %20 : vector<1x128xf32> to vector<8x128xf32>
    %22 = arith.addf %19, %21 : vector<8x128xf32>
    %23 = vector.extract_strided_slice %22 {offsets = [0, 0], sizes = [8, 2], strides = [1, 1]} : vector<8x128xf32> to vector<8x2xf32>
    %c0_17 = arith.constant 0 : index
    %c0_18 = arith.constant 0 : index
    %24 = vector.load %arg8[%c0_17, %c0_18] : memref<8x2xf32, #tpu.memory_space<vmem>>, vector<8x2xf32>
    tpu.vector_store %arg8[%c0_17, %c0_18], %23 {strides = array<i32>} : memref<8x2xf32, #tpu.memory_space<vmem>>, vector<8x2xf32>,
    return
  }
  func.func @transform_0(%arg0: i32) -> (i32, i32) {
    %c0_i32 = arith.constant 0 : i32
    %c0_i32_0 = arith.constant 0 : i32
    return %arg0, %c0_i32 : i32, i32
  }
  func.func @transform_1(%arg0: i32) -> (i32, i32) {
    %c0_i32 = arith.constant 0 : i32
    %c0_i32_0 = arith.constant 0 : i32
    %c0_i32_1 = arith.constant 0 : i32
    return %c0_i32, %c0_i32_0 : i32, i32
  }
  func.func @transform_2(%arg0: i32) -> (i32, i32) {
    %c0_i32 = arith.constant 0 : i32
    %c0_i32_0 = arith.constant 0 : i32
    %c0_i32_1 = arith.constant 0 : i32
    return %c0_i32, %c0_i32_0 : i32, i32
  }
  func.func @transform_3(%arg0: i32) -> (i32, i32) {
    %c0_i32 = arith.constant 0 : i32
    %c0_i32_0 = arith.constant 0 : i32
    %c0_i32_1 = arith.constant 0 : i32
    return %c0_i32, %c0_i32_0 : i32, i32
  }
  func.func @transform_4(%arg0: i32) -> (i32, i32) {
    %c0_i32 = arith.constant 0 : i32
    %c0_i32_0 = arith.constant 0 : i32
    %c0_i32_1 = arith.constant 0 : i32
    return %c0_i32, %c0_i32_0 : i32, i32
  }
  func.func @transform_5(%arg0: i32) -> (i32, i32) {
    %c0_i32 = arith.constant 0 : i32
    %c0_i32_0 = arith.constant 0 : i32
    %c0_i32_1 = arith.constant 0 : i32
    return %c0_i32, %c0_i32_0 : i32, i32
  }
  func.func @transform_6(%arg0: i32) -> (i32, i32) {
    %c0_i32 = arith.constant 0 : i32
    %c0_i32_0 = arith.constant 0 : i32
    %c0_i32_1 = arith.constant 0 : i32
    return %c0_i32, %c0_i32_0 : i32, i32
  }
  func.func @transform_7(%arg0: i32) -> (i32, i32) {
    %c0_i32 = arith.constant 0 : i32
    %c0_i32_0 = arith.constant 0 : i32
    return %arg0, %c0_i32 : i32, i32
  }
}

</mosaic_0001>

<bundles_post_ra>
// kernel: simple_nn_forward.1
= control target key start
LH: loop header
LB: loop body
LE: loop exit
PB: predicated region body
PF: predicated region fallthrough
CT: control target
= control target key end

     0   :  { %12 = vsyncpa [#allocation3], 0  ;;  %s2216_s0 = inlined_call_operand.hbm [shape: f32[8,512], index: 0, kind: input, shape index: {}]   ;;  %s2217_s1 = inlined_call_operand.hbm [shape: bf16[512,512], index: 1, kind: input, shape index: {}]   ;;  %s2218_s2 = inlined_call_operand.vmem [shape: f32[1,512], index: 2, kind: input, shape index: {}]   ;;  %s2219_s3 = inlined_call_operand.hbm [shape: bf16[512,128], index: 3, kind: input, shape index: {}]   ;;  %s2220_s4 = inlined_call_operand.vmem [shape: f32[1,128], index: 4, kind: input, shape index: {}]   ;;  %s2221_s5 = inlined_call_operand.hbm [shape: bf16[128,128], index: 5, kind: input, shape index: {}]   ;;  %s2222_s6 = inlined_call_operand.vmem [shape: f32[1,128], index: 6, kind: input, shape index: {}]   ;;  %s2223_s7 = inlined_call_operand.vmem [shape: f32[8,2], index: 7, kind: output, shape index: {}]  }
   0x1   :  { %13 = vsyncpa [#allocation5], 0 }
   0x2   :  { %14 = vsyncpa [#allocation8], 0  ;;  %s2106_s24 = smov [#allocation4]   ;;  %s2012_s28 = scalar_lea.hbm %s2217_s1, 16384 }
   0x3   :  { %s30_s25 = sshll.u32 %s2106_s24, 4  ;;  %p2013_p0 = scmp.ne.s32.totalorder %s2217_s1, %s2012_s28  ;;  %s31_s25 = int_to_ptr.vmem [resolvable:$true] %s30_s25 }
   0x4   :  { %p2016_p1 = scmp.lt.u32.totalorder %s2012_s28, %s2217_s1 }
   0x6   :  { %p2018_p2 = pnand %p2016_p1, %p2013_p0 }
   0x8   :  { %2021 = shalt.err (!%p2018_p2)
}
   0x9   :  { %s2022_s10 = scalar_lea.vmem %s31_s25, 16384  ;;  %p2027_p4 = scmp.lt.s32.totalorder %s31_s25, %s31_s25 }
   0xa   :  { %p2023_p3 = scmp.ne.s32.totalorder %s31_s25, %s2022_s10  ;;  %p2028_p5 = scmp.lt.s32.totalorder %s2022_s10, %s2022_s10 }
   0xc   :  { %p2029_p6 = por %p2028_p5, %p2027_p4 }
   0xe   :  { %p2030_p7 = pnand %p2029_p6, %p2023_p3 }
  0x10   :  { %2033 = shalt.err (!%p2030_p7)
}
  0x11   :  { %s2107_s11 = smov 256   ;;  %s2108_s12 = smov 16  }
  0x12   :  { %36 = dma.hbm_to_vmem [thread:$0]  %s2217_s1, 16384, %s31_s25, [#allocation5], %s2107_s11, %s2107_s11, %s2108_s12  }
  0x13   :  { %s2109_s15 = smov [#allocation2]   ;;  %s2110_s17 = smov [#allocation6]  }
  0x14   :  { %s21_s16 = sshll.u32 %s2109_s15, 4  ;;  %s44_s18 = sshll.u32 %s2110_s17, 4  ;;  %s22_s16 = int_to_ptr.vmem [resolvable:$true] %s21_s16  ;;  %s45_s18 = int_to_ptr.vmem [resolvable:$true] %s44_s18 }
  0x15   :  { %s2034_s21 = scalar_lea.hbm %s2216_s0, 512 }
  0x16   :  { %p2035_p8 = scmp.ne.s32.totalorder %s2216_s0, %s2034_s21  ;;  %p2038_p9 = scmp.lt.u32.totalorder %s2034_s21, %s2216_s0 }
  0x18   :  { %p2040_p10 = pnand %p2038_p9, %p2035_p8 }
  0x1a   :  { %2043 = shalt.err (!%p2040_p10)
}
  0x1b   :  { %s2044_s1 = scalar_lea.vmem %s22_s16, 512  ;;  %p2049_p12 = scmp.lt.s32.totalorder %s22_s16, %s22_s16 }
  0x1c   :  { %p2045_p11 = scmp.ne.s32.totalorder %s22_s16, %s2044_s1  ;;  %p2050_p13 = scmp.lt.s32.totalorder %s2044_s1, %s2044_s1 }
  0x1e   :  { %p2051_p0 = por %p2050_p13, %p2049_p12 }
  0x20   :  { %p2052_p1 = pnand %p2051_p0, %p2045_p11 }
  0x22   :  { %2055 = shalt.err (!%p2052_p1)
}
  0x23   :  { %24 = dma.hbm_to_vmem [thread:$0]  %s2216_s0, 512, %s22_s16, [#allocation3]  }
  0x24   :  { %s2056_s30 = scalar_lea.hbm %s2219_s3, 4096 }
  0x25   :  { %p2057_p2 = scmp.ne.s32.totalorder %s2219_s3, %s2056_s30  ;;  %p2060_p3 = scmp.lt.u32.totalorder %s2056_s30, %s2219_s3 }
  0x27   :  { %p2062_p4 = pnand %p2060_p3, %p2057_p2 }
  0x29   :  { %2065 = shalt.err (!%p2062_p4)
}
  0x2a   :  { %s2066_s12 = scalar_lea.vmem %s45_s18, 4096  ;;  %p2071_p6 = scmp.lt.s32.totalorder %s45_s18, %s45_s18 }
  0x2b   :  { %p2067_p5 = scmp.ne.s32.totalorder %s45_s18, %s2066_s12  ;;  %p2072_p7 = scmp.lt.s32.totalorder %s2066_s12, %s2066_s12 }
  0x2d   :  { %p2073_p8 = por %p2072_p7, %p2071_p6 }
  0x2f   :  { %p2074_p9 = pnand %p2073_p8, %p2067_p5 }
  0x31   :  { %2077 = shalt.err (!%p2074_p9)
}
  0x32   :  { %s2111_s0 = smov 64   ;;  %s2112_s13 = smov 4  }
  0x33   :  { %50 = dma.hbm_to_vmem [thread:$0]  %s2219_s3, 4096, %s45_s18, [#allocation5], %s2111_s0, %s2111_s0, %s2112_s13  }
  0x34   :  { %s2113_s16 = smov [#allocation7]   ;;  %s2078_s21 = scalar_lea.hbm %s2221_s5, 1024 }
  0x35   :  { %s58_s17 = sshll.u32 %s2113_s16, 4  ;;  %p2079_p10 = scmp.ne.s32.totalorder %s2221_s5, %s2078_s21  ;;  %s59_s17 = int_to_ptr.vmem [resolvable:$true] %s58_s17 }
  0x36   :  { %p2082_p11 = scmp.lt.u32.totalorder %s2078_s21, %s2221_s5 }
  0x38   :  { %p2084_p12 = pnand %p2082_p11, %p2079_p10 }
  0x3a   :  { %2087 = shalt.err (!%p2084_p12)
}
  0x3b   :  { %s2088_s1 = scalar_lea.vmem %s59_s17, 1024  ;;  %p2093_p0 = scmp.lt.s32.totalorder %s59_s17, %s59_s17 }
  0x3c   :  { %p2089_p13 = scmp.ne.s32.totalorder %s59_s17, %s2088_s1  ;;  %p2094_p1 = scmp.lt.s32.totalorder %s2088_s1, %s2088_s1 }
  0x3e   :  { %p2095_p2 = por %p2094_p1, %p2093_p0 }
  0x40   :  { %p2096_p3 = pnand %p2095_p2, %p2089_p13 }
  0x42   :  { %2099 = shalt.err (!%p2096_p3)
}
  0x43   :  { %64 = dma.hbm_to_vmem [thread:$0]  %s2221_s5, 1024, %s59_s17, [#allocation8], %s2111_s0, %s2111_s0, %s2112_s13  }
  0x44   :  { %2100 = dma.done.wait [#allocation3], 512  }
  0x45   :  { %2101 = vsyncadd [#allocation3], 4294966784 }
  0x46   :  { %2102 = dma.done.wait [#allocation5], 20480  }
  0x47   :  { %2103 = vsyncadd [#allocation5], 4294946816 }
  0x48   :  { %2104 = dma.done.wait [#allocation8], 1024  }
  0x49   :  { %2105 = vsyncadd [#allocation8], 4294966272  ;;  %v1780_v0 = vld [vmem:[#allocation4 + $0x4] ss:$16 sps:$4 sm:$0xff]   ;;  %v1782_v1 = vld [vmem:[#allocation4 + $0xc] ss:$16 sps:$4 sm:$0xff]  }
  0x4a   :  { %878 = vmatprep.subr.bf16.mxu0 %v1780_v0  ;;  %v1784_v2 = vld [vmem:[#allocation4] ss:$16 sps:$4 sm:$0xff]   ;;  %v1785_v3 = vld [vmem:[#allocation4 + $0x8] ss:$16 sps:$4 sm:$0xff]   ;;  %960 = vmatprep.subr.bf16.mxu1 %v1782_v1  ;;  %v1786_v4 = vld [vmem:[#allocation4 + $0x24] ss:$16 sps:$4 sm:$0xff]  }
  0x4b   :  { %879 = vmatpush1.bf16.msra.mxu0 %v1784_v2  ;;  %961 = vmatpush1.bf16.msra.mxu1 %v1785_v3  ;;  %v1788_v5 = vld [vmem:[#allocation4 + $0x2c] ss:$16 sps:$4 sm:$0xff]   ;;  %v1790_v6 = vld [vmem:[#allocation4 + $0x20] ss:$16 sps:$4 sm:$0xff]   ;;  %v1791_v7 = vld [vmem:[#allocation4 + $0x28] ss:$16 sps:$4 sm:$0xff]  }
  0x4c   :  { %880 = vmatprep.subr.bf16.mxu0 %v1786_v4  ;;  %962 = vmatprep.subr.bf16.mxu1 %v1788_v5  ;;  %v1792_v8 = vld [vmem:[#allocation4 + $0x44] ss:$16 sps:$4 sm:$0xff]   ;;  %v1794_v9 = vld [vmem:[#allocation4 + $0x4c] ss:$16 sps:$4 sm:$0xff]   ;;  %v1796_v10 = vld [vmem:[#allocation4 + $0x40] ss:$16 sps:$4 sm:$0xff]  }
  0x4d   :  { %v1797_v11 = vld [vmem:[#allocation4 + $0x48] ss:$16 sps:$4 sm:$0xff]   ;;  %v1798_v12 = vld [vmem:[#allocation4 + $0x64] ss:$16 sps:$4 sm:$0xff]   ;;  %v1800_v13 = vld [vmem:[#allocation4 + $0x6c] ss:$16 sps:$4 sm:$0xff]  }
  0x4e   :  { %v1802_v14 = vld [vmem:[#allocation4 + $0x60] ss:$16 sps:$4 sm:$0xff]   ;;  %v1803_v15 = vld [vmem:[#allocation4 + $0x68] ss:$16 sps:$4 sm:$0xff]   ;;  %v1804_v16 = vld [vmem:[#allocation4 + $0x84] ss:$16 sps:$4 sm:$0xff]  }
  0x4f   :  { %881 = vmatpush1.bf16.msra.mxu0 %v1790_v6  ;;  %963 = vmatpush1.bf16.msra.mxu1 %v1791_v7  ;;  %v1806_v17 = vld [vmem:[#allocation4 + $0x8c] ss:$16 sps:$4 sm:$0xff]   ;;  %v1808_v18 = vld [vmem:[#allocation4 + $0x80] ss:$16 sps:$4 sm:$0xff]   ;;  %v1809_v19 = vld [vmem:[#allocation4 + $0x88] ss:$16 sps:$4 sm:$0xff]  }
  0x50   :  { %882 = vmatprep.subr.bf16.mxu0 %v1792_v8  ;;  %964 = vmatprep.subr.bf16.mxu1 %v1794_v9  ;;  %v1810_v20 = vld [vmem:[#allocation4 + $0xa4] ss:$16 sps:$4 sm:$0xff]   ;;  %v1812_v21 = vld [vmem:[#allocation4 + $0xac] ss:$16 sps:$4 sm:$0xff]   ;;  %v1814_v22 = vld [vmem:[#allocation4 + $0xa0] ss:$16 sps:$4 sm:$0xff]  }
  0x51   :  { %v1815_v23 = vld [vmem:[#allocation4 + $0xa8] ss:$16 sps:$4 sm:$0xff]   ;;  %v1816_v24 = vld [vmem:[#allocation4 + $0xc4] ss:$16 sps:$4 sm:$0xff]   ;;  %v1818_v25 = vld [vmem:[#allocation4 + $0xcc] ss:$16 sps:$4 sm:$0xff]  }
  0x52   :  { %v1820_v26 = vld [vmem:[#allocation4 + $0xc0] ss:$16 sps:$4 sm:$0xff]   ;;  %v1821_v27 = vld [vmem:[#allocation4 + $0xc8] ss:$16 sps:$4 sm:$0xff]   ;;  %v1822_v28 = vld [vmem:[#allocation4 + $0xe4] ss:$16 sps:$4 sm:$0xff]  }
  0x53   :  { %883 = vmatpush1.bf16.msra.mxu0 %v1796_v10  ;;  %965 = vmatpush1.bf16.msra.mxu1 %v1797_v11  ;;  %v1824_v29 = vld [vmem:[#allocation4 + $0xec] ss:$16 sps:$4 sm:$0xff]   ;;  %v1826_v30 = vld [vmem:[#allocation4 + $0xe0] ss:$16 sps:$4 sm:$0xff]   ;;  %v1827_v31 = vld [vmem:[#allocation4 + $0xe8] ss:$16 sps:$4 sm:$0xff]  }
  0x54   :  { %884 = vmatprep.subr.bf16.mxu0 %v1798_v12  ;;  %966 = vmatprep.subr.bf16.mxu1 %v1800_v13  ;;  %v1828_v32 = vld [vmem:[#allocation4 + $0x104] ss:$16 sps:$4 sm:$0xff]   ;;  %v1830_v33 = vld [vmem:[#allocation4 + $0x10c] ss:$16 sps:$4 sm:$0xff]   ;;  %v1832_v34 = vld [vmem:[#allocation4 + $0x100] ss:$16 sps:$4 sm:$0xff]  }
  0x55   :  { %v1833_v35 = vld [vmem:[#allocation4 + $0x108] ss:$16 sps:$4 sm:$0xff]   ;;  %v1834_v36 = vld [vmem:[#allocation4 + $0x124] ss:$16 sps:$4 sm:$0xff]   ;;  %v1836_v37 = vld [vmem:[#allocation4 + $0x12c] ss:$16 sps:$4 sm:$0xff]  }
  0x56   :  { %v1838_v38 = vld [vmem:[#allocation4 + $0x120] ss:$16 sps:$4 sm:$0xff]   ;;  %v1839_v39 = vld [vmem:[#allocation4 + $0x128] ss:$16 sps:$4 sm:$0xff]   ;;  %v1840_v40 = vld [vmem:[#allocation4 + $0x144] ss:$16 sps:$4 sm:$0xff]  }
  0x57   :  { %885 = vmatpush1.bf16.msra.mxu0 %v1802_v14  ;;  %967 = vmatpush1.bf16.msra.mxu1 %v1803_v15  ;;  %v1842_v41 = vld [vmem:[#allocation4 + $0x14c] ss:$16 sps:$4 sm:$0xff]   ;;  %v1844_v42 = vld [vmem:[#allocation4 + $0x140] ss:$16 sps:$4 sm:$0xff]   ;;  %v1845_v43 = vld [vmem:[#allocation4 + $0x148] ss:$16 sps:$4 sm:$0xff]  }
  0x58   :  { %886 = vmatprep.subr.bf16.mxu0 %v1804_v16  ;;  %968 = vmatprep.subr.bf16.mxu1 %v1806_v17  ;;  %v1846_v44 = vld [vmem:[#allocation4 + $0x164] ss:$16 sps:$4 sm:$0xff]   ;;  %v1848_v45 = vld [vmem:[#allocation4 + $0x16c] ss:$16 sps:$4 sm:$0xff]   ;;  %v1850_v47 = vld [vmem:[#allocation4 + $0x160] ss:$16 sps:$4 sm:$0xff]  }
  0x59   :  { %v81_v46 = vld [vmem:[#allocation2 + $0x8] sm:$0xff]  ;;  %v1852_v50 = vld [vmem:[#allocation4 + $0x184] ss:$16 sps:$4 sm:$0xff]   ;;  %v1856_v52 = vld [vmem:[#allocation4 + $0x180] ss:$16 sps:$4 sm:$0xff]   ;;  %vm2115_vm0 = vmmov 0  }
  0x5a   :  { %v85_v48 = vpack.c.bf16 %v81_v46, %v81_v46  ;;  %v1851_v49 = vld [vmem:[#allocation4 + $0x168] ss:$16 sps:$4 sm:$0xff]   ;;  %v1854_v51 = vld [vmem:[#allocation4 + $0x18c] ss:$16 sps:$4 sm:$0xff]   ;;  %v1858_v54 = vld [vmem:[#allocation4 + $0x1a4] ss:$16 sps:$4 sm:$0xff]  }
  0x5b   :  { %887 = vmatpush1.bf16.msra.mxu0 %v1808_v18  ;;  %969 = vmatpush1.bf16.msra.mxu1 %v1809_v19  ;;  %v1857_v53 = vld [vmem:[#allocation4 + $0x188] ss:$16 sps:$4 sm:$0xff]   ;;  %v1860_v55 = vld [vmem:[#allocation4 + $0x1ac] ss:$16 sps:$4 sm:$0xff]   ;;  %v1862_v56 = vld [vmem:[#allocation4 + $0x1a0] ss:$16 sps:$4 sm:$0xff]  }
  0x5c   :  { %888 = vmatprep.subr.bf16.mxu0 %v1810_v20  ;;  %970 = vmatprep.subr.bf16.mxu1 %v1812_v21  ;;  %v1863_v57 = vld [vmem:[#allocation4 + $0x1a8] ss:$16 sps:$4 sm:$0xff]   ;;  %v1864_v58 = vld [vmem:[#allocation4 + $0x1c4] ss:$16 sps:$4 sm:$0xff]   ;;  %v1866_v59 = vld [vmem:[#allocation4 + $0x1cc] ss:$16 sps:$4 sm:$0xff]  }
  0x5d   :  { %910 = vmatprep.mubr.bf16.mxu0 %v85_v48  ;;  %992 = vmatprep.mubr.bf16.mxu1 %v85_v48  ;;  %v1868_v60 = vld [vmem:[#allocation4 + $0x1c0] ss:$16 sps:$4 sm:$0xff]   ;;  %v1869_v61 = vld [vmem:[#allocation4 + $0x1c8] ss:$16 sps:$4 sm:$0xff]   ;;  %v1870_v62 = vld [vmem:[#allocation4 + $0x1e4] ss:$16 sps:$4 sm:$0xff]  }
  0x5e   :  { %v1872_v63 = vld [vmem:[#allocation4 + $0x1ec] ss:$16 sps:$4 sm:$0xff]   ;;  %v1874_v0 = vld [vmem:[#allocation4 + $0x1e0] ss:$16 sps:$4 sm:$0xff]   ;;  %v1875_v1 = vld [vmem:[#allocation4 + $0x1e8] ss:$16 sps:$4 sm:$0xff]  }
  0x5f   :  { %889 = vmatpush1.bf16.msra.mxu0 %v1814_v22  ;;  %971 = vmatpush1.bf16.msra.mxu1 %v1815_v23  ;;  %v80_v2 = vld [vmem:[#allocation2] sm:$0xff]  ;;  %v1881_v4 = vld [vmem:[#allocation4 + $0x20c] ss:$16 sps:$4 sm:$0xff]   ;;  %v1879_v7 = vld [vmem:[#allocation4 + $0x208] ss:$16 sps:$4 sm:$0xff]   ;;  %vm1506_vm1 = vcmask 15360  }
  0x60   :  { %890 = vmatprep.subr.bf16.mxu0 %v1816_v24  ;;  %972 = vmatprep.subr.bf16.mxu1 %v1818_v25  ;;  %v1878_v3 = vld [vmem:[#allocation4 + $0x204] ss:$16 sps:$4 sm:$0xff]   ;;  %v84_v5 = vpack.c.bf16 %v80_v2, %v80_v2  ;;  %v1876_v6 = vld [vmem:[#allocation4 + $0x200] ss:$16 sps:$4 sm:$0xff]   ;;  %v1887_v9 = vld [vmem:[#allocation4 + $0x22c] ss:$16 sps:$4 sm:$0xff]  }
  0x61   :  { %v1884_v8 = vld [vmem:[#allocation4 + $0x224] ss:$16 sps:$4 sm:$0xff]   ;;  %v1882_v10 = vld [vmem:[#allocation4 + $0x220] ss:$16 sps:$4 sm:$0xff]   ;;  %v1885_v11 = vld [vmem:[#allocation4 + $0x228] ss:$16 sps:$4 sm:$0xff]  }
  0x62   :  { %v1890_v12 = vld [vmem:[#allocation4 + $0x244] ss:$16 sps:$4 sm:$0xff]   ;;  %v1893_v13 = vld [vmem:[#allocation4 + $0x24c] ss:$16 sps:$4 sm:$0xff]   ;;  %v1888_v14 = vld [vmem:[#allocation4 + $0x240] ss:$16 sps:$4 sm:$0xff]  }
  0x63   :  { %891 = vmatpush1.bf16.msra.mxu0 %v1820_v26  ;;  %973 = vmatpush1.bf16.msra.mxu1 %v1821_v27  ;;  %v1891_v15 = vld [vmem:[#allocation4 + $0x248] ss:$16 sps:$4 sm:$0xff]   ;;  %v1896_v16 = vld [vmem:[#allocation4 + $0x264] ss:$16 sps:$4 sm:$0xff]   ;;  %v1899_v17 = vld [vmem:[#allocation4 + $0x26c] ss:$16 sps:$4 sm:$0xff]  }
  0x64   :  { %892 = vmatprep.subr.bf16.mxu0 %v1822_v28  ;;  %974 = vmatprep.subr.bf16.mxu1 %v1824_v29  ;;  %v1894_v18 = vld [vmem:[#allocation4 + $0x260] ss:$16 sps:$4 sm:$0xff]   ;;  %v1897_v19 = vld [vmem:[#allocation4 + $0x268] ss:$16 sps:$4 sm:$0xff]   ;;  %v1902_v20 = vld [vmem:[#allocation4 + $0x284] ss:$16 sps:$4 sm:$0xff]  }
  0x65   :  { %v1905_v21 = vld [vmem:[#allocation4 + $0x28c] ss:$16 sps:$4 sm:$0xff]   ;;  %v1900_v22 = vld [vmem:[#allocation4 + $0x280] ss:$16 sps:$4 sm:$0xff]   ;;  %v1903_v23 = vld [vmem:[#allocation4 + $0x288] ss:$16 sps:$4 sm:$0xff]  }
  0x66   :  { %v1908_v24 = vld [vmem:[#allocation4 + $0x2a4] ss:$16 sps:$4 sm:$0xff]   ;;  %v1911_v25 = vld [vmem:[#allocation4 + $0x2ac] ss:$16 sps:$4 sm:$0xff]   ;;  %v1906_v26 = vld [vmem:[#allocation4 + $0x2a0] ss:$16 sps:$4 sm:$0xff]  }
  0x67   :  { %893 = vmatpush1.bf16.msra.mxu0 %v1826_v30  ;;  %975 = vmatpush1.bf16.msra.mxu1 %v1827_v31  ;;  %v1909_v27 = vld [vmem:[#allocation4 + $0x2a8] ss:$16 sps:$4 sm:$0xff]   ;;  %v1914_v28 = vld [vmem:[#allocation4 + $0x2c4] ss:$16 sps:$4 sm:$0xff]   ;;  %v1917_v29 = vld [vmem:[#allocation4 + $0x2cc] ss:$16 sps:$4 sm:$0xff]  }
  0x68   :  { %894 = vmatprep.subr.bf16.mxu0 %v1828_v32  ;;  %976 = vmatprep.subr.bf16.mxu1 %v1830_v33  ;;  %v1912_v30 = vld [vmem:[#allocation4 + $0x2c0] ss:$16 sps:$4 sm:$0xff]   ;;  %v83_v31 = vld [vmem:[#allocation2 + $0x18] sm:$0xff]  ;;  %v1938_v46 = vld [vmem:[#allocation4 + $0x344] ss:$16 sps:$4 sm:$0xff]  }
  0x69   :  { %v1915_v32 = vld [vmem:[#allocation4 + $0x2c8] ss:$16 sps:$4 sm:$0xff]   ;;  %v87_v33 = vpack.c.bf16 %v83_v31, %v83_v31  ;;  %v1936_v48 = vld [vmem:[#allocation4 + $0x340] ss:$16 sps:$4 sm:$0xff]   ;;  %v1968_v2 = vld [vmem:[#allocation4 + $0x3e4] ss:$16 sps:$4 sm:$0xff]  }
  0x6a   :  { %v1995_v31 = vld [vmem:[#allocation6 + $0xa8] sm:$0xff]  }
  0x6b   :  { %895 = vmatpush1.bf16.msra.mxu0 %v1832_v34  ;;  %977 = vmatpush1.bf16.msra.mxu1 %v1833_v35  ;;  %v1920_v34 = vld [vmem:[#allocation4 + $0x2e4] ss:$16 sps:$4 sm:$0xff]   ;;  %v1923_v35 = vld [vmem:[#allocation4 + $0x2ec] ss:$16 sps:$4 sm:$0xff]  }
  0x6c   :  { %896 = vmatprep.subr.bf16.mxu0 %v1834_v36  ;;  %978 = vmatprep.subr.bf16.mxu1 %v1836_v37  ;;  %v1918_v36 = vld [vmem:[#allocation4 + $0x2e0] ss:$16 sps:$4 sm:$0xff]   ;;  %v1921_v37 = vld [vmem:[#allocation4 + $0x2e8] ss:$16 sps:$4 sm:$0xff]  }
  0x6f   :  { %897 = vmatpush1.bf16.msra.mxu0 %v1838_v38  ;;  %979 = vmatpush1.bf16.msra.mxu1 %v1839_v39  ;;  %v1926_v38 = vld [vmem:[#allocation4 + $0x304] ss:$16 sps:$4 sm:$0xff]   ;;  %v1929_v39 = vld [vmem:[#allocation4 + $0x30c] ss:$16 sps:$4 sm:$0xff]  }
  0x70   :  { %898 = vmatprep.subr.bf16.mxu0 %v1840_v40  ;;  %980 = vmatprep.subr.bf16.mxu1 %v1842_v41  ;;  %v1924_v40 = vld [vmem:[#allocation4 + $0x300] ss:$16 sps:$4 sm:$0xff]   ;;  %v1927_v41 = vld [vmem:[#allocation4 + $0x308] ss:$16 sps:$4 sm:$0xff]  }
  0x73   :  { %899 = vmatpush1.bf16.msra.mxu0 %v1844_v42  ;;  %981 = vmatpush1.bf16.msra.mxu1 %v1845_v43  ;;  %v1932_v42 = vld [vmem:[#allocation4 + $0x324] ss:$16 sps:$4 sm:$0xff]   ;;  %v1935_v43 = vld [vmem:[#allocation4 + $0x32c] ss:$16 sps:$4 sm:$0xff]  }
  0x74   :  { %900 = vmatprep.subr.bf16.mxu0 %v1846_v44  ;;  %982 = vmatprep.subr.bf16.mxu1 %v1848_v45  ;;  %v1930_v44 = vld [vmem:[#allocation4 + $0x320] ss:$16 sps:$4 sm:$0xff]   ;;  %v1933_v45 = vld [vmem:[#allocation4 + $0x328] ss:$16 sps:$4 sm:$0xff]  }
  0x77   :  { %901 = vmatpush1.bf16.msra.mxu0 %v1850_v47  ;;  %983 = vmatpush1.bf16.msra.mxu1 %v1851_v49  ;;  %v1941_v47 = vld [vmem:[#allocation4 + $0x34c] ss:$16 sps:$4 sm:$0xff]   ;;  %v1939_v49 = vld [vmem:[#allocation4 + $0x348] ss:$16 sps:$4 sm:$0xff]  }
  0x78   :  { %902 = vmatprep.subr.bf16.mxu0 %v1852_v50  ;;  %984 = vmatprep.subr.bf16.mxu1 %v1854_v51  ;;  %v1944_v50 = vld [vmem:[#allocation4 + $0x364] ss:$16 sps:$4 sm:$0xff]   ;;  %v1947_v51 = vld [vmem:[#allocation4 + $0x36c] ss:$16 sps:$4 sm:$0xff]  }
  0x7b   :  { %903 = vmatpush1.bf16.msra.mxu0 %v1856_v52  ;;  %985 = vmatpush1.bf16.msra.mxu1 %v1857_v53  ;;  %v1942_v52 = vld [vmem:[#allocation4 + $0x360] ss:$16 sps:$4 sm:$0xff]   ;;  %v1945_v53 = vld [vmem:[#allocation4 + $0x368] ss:$16 sps:$4 sm:$0xff]  }
  0x7c   :  { %904 = vmatprep.subr.bf16.mxu0 %v1858_v54  ;;  %986 = vmatprep.subr.bf16.mxu1 %v1860_v55  ;;  %v1950_v54 = vld [vmem:[#allocation4 + $0x384] ss:$16 sps:$4 sm:$0xff]   ;;  %v1953_v55 = vld [vmem:[#allocation4 + $0x38c] ss:$16 sps:$4 sm:$0xff]  }
  0x7f   :  { %905 = vmatpush1.bf16.msra.mxu0 %v1862_v56  ;;  %987 = vmatpush1.bf16.msra.mxu1 %v1863_v57  ;;  %v1948_v56 = vld [vmem:[#allocation4 + $0x380] ss:$16 sps:$4 sm:$0xff]   ;;  %v1951_v57 = vld [vmem:[#allocation4 + $0x388] ss:$16 sps:$4 sm:$0xff]  }
  0x80   :  { %906 = vmatprep.subr.bf16.mxu0 %v1864_v58  ;;  %988 = vmatprep.subr.bf16.mxu1 %v1866_v59  ;;  %v1956_v58 = vld [vmem:[#allocation4 + $0x3a4] ss:$16 sps:$4 sm:$0xff]   ;;  %v1959_v59 = vld [vmem:[#allocation4 + $0x3ac] ss:$16 sps:$4 sm:$0xff]  }
  0x83   :  { %907 = vmatpush1.bf16.msra.mxu0 %v1868_v60  ;;  %989 = vmatpush1.bf16.msra.mxu1 %v1869_v61  ;;  %v1954_v60 = vld [vmem:[#allocation4 + $0x3a0] ss:$16 sps:$4 sm:$0xff]   ;;  %v1957_v61 = vld [vmem:[#allocation4 + $0x3a8] ss:$16 sps:$4 sm:$0xff]  }
  0x84   :  { %908 = vmatprep.subr.bf16.mxu0 %v1870_v62  ;;  %990 = vmatprep.subr.bf16.mxu1 %v1872_v63  ;;  %v1962_v62 = vld [vmem:[#allocation4 + $0x3c4] ss:$16 sps:$4 sm:$0xff]   ;;  %v1965_v63 = vld [vmem:[#allocation4 + $0x3cc] ss:$16 sps:$4 sm:$0xff]  }
  0x87   :  { %909 = vmatpush1.bf16.msra.mxu0 %v1874_v0  ;;  %991 = vmatpush1.bf16.msra.mxu1 %v1875_v1  ;;  %v1960_v0 = vld [vmem:[#allocation4 + $0x3c0] ss:$16 sps:$4 sm:$0xff]   ;;  %v1963_v1 = vld [vmem:[#allocation4 + $0x3c8] ss:$16 sps:$4 sm:$0xff]  }
  0x88   :  { %919 = vmatprep.subr.bf16.mxu0 %v1878_v3  ;;  %1001 = vmatprep.subr.bf16.mxu1 %v1881_v4  ;;  %v1971_v3 = vld [vmem:[#allocation4 + $0x3ec] ss:$16 sps:$4 sm:$0xff]   ;;  %v1966_v4 = vld [vmem:[#allocation4 + $0x3e0] ss:$16 sps:$4 sm:$0xff]  }
  0x8a   :  { %911 = vmatmul.mubr.bf16.vlgmr.msra.gmra.mrb[0].mxu0 %v84_v5  ;;  %993 = vmatmul.mubr.bf16.vlgmr.msra.gmra.mrb[0].mxu1 %v84_v5  ;;  %v1969_v5 = vld [vmem:[#allocation4 + $0x3e8] ss:$16 sps:$4 sm:$0xff]  }
  0x8b   :  { %920 = vmatpush1.bf16.msra.mxu0 %v1876_v6  ;;  %1002 = vmatpush1.bf16.msra.mxu1 %v1879_v7  ;;  %v82_v6 = vld [vmem:[#allocation2 + $0x10] sm:$0xff]  ;;  %v1972_v7 = vld [vmem:[#allocation6 + $0x40] sm:$0xff]  }
  0x8c   :  { %921 = vmatprep.subr.bf16.mxu0 %v1884_v8  ;;  %1003 = vmatprep.subr.bf16.mxu1 %v1887_v9  ;;  %v1973_v8 = vld [vmem:[#allocation6 + $0xc0] sm:$0xff]   ;;  %v86_v9 = vpack.c.bf16 %v82_v6, %v82_v6 }
  0x8d   :  { %951 = vmatprep.mubr.bf16.mxu0 %v87_v33  ;;  %1033 = vmatprep.mubr.bf16.mxu1 %v87_v33  ;;  %v1997_v33 = vld [vmem:[#allocation6 + $0xf0] sm:$0xff]   ;;  %v2004_v6 = vld [vmem:[#allocation7] sm:$0xff]  }
  0x8f   :  { %922 = vmatpush1.bf16.msra.mxu0 %v1882_v10  ;;  %1004 = vmatpush1.bf16.msra.mxu1 %v1885_v11  ;;  %v1974_v10 = vld [vmem:[#allocation6] sm:$0xff]  }
  0x90   :  { %923 = vmatprep.subr.bf16.mxu0 %v1890_v12  ;;  %1005 = vmatprep.subr.bf16.mxu1 %v1893_v13  ;;  %v1975_v11 = vld [vmem:[#allocation6 + $0x80] sm:$0xff]   ;;  %v1976_v12 = vld [vmem:[#allocation6 + $0x48] sm:$0xff]  }
  0x91   :  { %v1977_v13 = vld [vmem:[#allocation6 + $0xc8] sm:$0xff]  }
  0x93   :  { %924 = vmatpush1.bf16.msra.mxu0 %v1888_v14  ;;  %1006 = vmatpush1.bf16.msra.mxu1 %v1891_v15  ;;  %v1978_v14 = vld [vmem:[#allocation6 + $0x8] sm:$0xff]  }
  0x94   :  { %925 = vmatprep.subr.bf16.mxu0 %v1896_v16  ;;  %1007 = vmatprep.subr.bf16.mxu1 %v1899_v17  ;;  %v1979_v15 = vld [vmem:[#allocation6 + $0x88] sm:$0xff]   ;;  %v1980_v16 = vld [vmem:[#allocation6 + $0x50] sm:$0xff]  }
  0x95   :  { %v1981_v17 = vld [vmem:[#allocation6 + $0xd0] sm:$0xff]  }
  0x97   :  { %926 = vmatpush1.bf16.msra.mxu0 %v1894_v18  ;;  %1008 = vmatpush1.bf16.msra.mxu1 %v1897_v19  ;;  %v1982_v18 = vld [vmem:[#allocation6 + $0x10] sm:$0xff]  }
  0x98   :  { %927 = vmatprep.subr.bf16.mxu0 %v1902_v20  ;;  %1009 = vmatprep.subr.bf16.mxu1 %v1905_v21  ;;  %v1983_v19 = vld [vmem:[#allocation6 + $0x90] sm:$0xff]   ;;  %v1984_v20 = vld [vmem:[#allocation6 + $0x58] sm:$0xff]  }
  0x99   :  { %v1985_v21 = vld [vmem:[#allocation6 + $0xd8] sm:$0xff]  }
  0x9b   :  { %928 = vmatpush1.bf16.msra.mxu0 %v1900_v22  ;;  %1010 = vmatpush1.bf16.msra.mxu1 %v1903_v23  ;;  %v1986_v22 = vld [vmem:[#allocation6 + $0x18] sm:$0xff]  }
  0x9c   :  { %929 = vmatprep.subr.bf16.mxu0 %v1908_v24  ;;  %1011 = vmatprep.subr.bf16.mxu1 %v1911_v25  ;;  %v1987_v23 = vld [vmem:[#allocation6 + $0x98] sm:$0xff]   ;;  %v1988_v24 = vld [vmem:[#allocation6 + $0x60] sm:$0xff]  }
  0x9d   :  { %v1989_v25 = vld [vmem:[#allocation6 + $0xe0] sm:$0xff]  }
  0x9f   :  { %930 = vmatpush1.bf16.msra.mxu0 %v1906_v26  ;;  %1012 = vmatpush1.bf16.msra.mxu1 %v1909_v27  ;;  %v1990_v26 = vld [vmem:[#allocation6 + $0x20] sm:$0xff]  }
  0xa0   :  { %931 = vmatprep.subr.bf16.mxu0 %v1914_v28  ;;  %1013 = vmatprep.subr.bf16.mxu1 %v1917_v29  ;;  %v1991_v27 = vld [vmem:[#allocation6 + $0xa0] sm:$0xff]   ;;  %v1992_v28 = vld [vmem:[#allocation6 + $0x68] sm:$0xff]  }
  0xa1   :  { %v1993_v29 = vld [vmem:[#allocation6 + $0xe8] sm:$0xff]  }
  0xa3   :  { %932 = vmatpush1.bf16.msra.mxu0 %v1912_v30  ;;  %1014 = vmatpush1.bf16.msra.mxu1 %v1915_v32  ;;  %v1994_v30 = vld [vmem:[#allocation6 + $0x28] sm:$0xff]   ;;  %v1996_v32 = vld [vmem:[#allocation6 + $0x70] sm:$0xff]  }
  0xa4   :  { %933 = vmatprep.subr.bf16.mxu0 %v1920_v34  ;;  %1015 = vmatprep.subr.bf16.mxu1 %v1923_v35  ;;  %v1998_v34 = vld [vmem:[#allocation6 + $0x30] sm:$0xff]  }
  0xa5   :  { %v1999_v35 = vld [vmem:[#allocation6 + $0xb0] sm:$0xff]  }
  0xa7   :  { %934 = vmatpush1.bf16.msra.mxu0 %v1918_v36  ;;  %1016 = vmatpush1.bf16.msra.mxu1 %v1921_v37  ;;  %v2000_v36 = vld [vmem:[#allocation6 + $0x78] sm:$0xff]  }
  0xa8   :  { %935 = vmatprep.subr.bf16.mxu0 %v1926_v38  ;;  %1017 = vmatprep.subr.bf16.mxu1 %v1929_v39  ;;  %v2001_v37 = vld [vmem:[#allocation6 + $0xf8] sm:$0xff]  }
  0xa9   :  { %v2002_v38 = vld [vmem:[#allocation6 + $0x38] sm:$0xff]  }
  0xaa   :  { %v2003_v39 = vld [vmem:[#allocation6 + $0xb8] sm:$0xff]  }
  0xab   :  { %936 = vmatpush1.bf16.msra.mxu0 %v1924_v40  ;;  %1018 = vmatpush1.bf16.msra.mxu1 %v1927_v41  ;;  %v2114_v40 = vmov 0.0   ;;  %v218_v41 = vlaneseq }
  0xac   :  { %937 = vmatprep.subr.bf16.mxu0 %v1932_v42  ;;  %1019 = vmatprep.subr.bf16.mxu1 %v1935_v43 }
  0xad   :  { %v219_v42 = vshrl.u32 %v218_v41, 7 }
  0xaf   :  { %938 = vmatpush1.bf16.msra.mxu0 %v1930_v44  ;;  %1020 = vmatpush1.bf16.msra.mxu1 %v1933_v45  ;;  %v220_v43 = vsub.s32 0, %v219_v42  ;;  %v228_v44 = vsub.s32 2, %v219_v42  ;;  %v216_v45 = vld [vmem:[%s2218_s2] sm:$0xf] }
  0xb0   :  { %939 = vmatprep.subr.bf16.mxu0 %v1938_v46  ;;  %1021 = vmatprep.subr.bf16.mxu1 %v1941_v47  ;;  %v224_v46 = vsub.s32 1, %v219_v42  ;;  %v232_v47 = vsub.s32 3, %v219_v42 }
  0xb3   :  { %940 = vmatpush1.bf16.msra.mxu0 %v1936_v48  ;;  %1022 = vmatpush1.bf16.msra.mxu1 %v1939_v49  ;;  %v221_v48 = vrot.slane %v216_v45, %v220_v43  ;;  %v229_v49 = vrot.slane %v216_v45, %v228_v44 }
  0xb4   :  { %941 = vmatprep.subr.bf16.mxu0 %v1944_v50  ;;  %1023 = vmatprep.subr.bf16.mxu1 %v1947_v51  ;;  %v225_v50 = vrot.slane %v216_v45, %v224_v46  ;;  %v233_v51 = vrot.slane %v216_v45, %v232_v47 }
  0xb7   :  { %942 = vmatpush1.bf16.msra.mxu0 %v1942_v52  ;;  %1024 = vmatpush1.bf16.msra.mxu1 %v1945_v53 }
  0xb8   :  { %943 = vmatprep.subr.bf16.mxu0 %v1950_v54  ;;  %1025 = vmatprep.subr.bf16.mxu1 %v1953_v55 }
  0xbb   :  { %944 = vmatpush1.bf16.msra.mxu0 %v1948_v56  ;;  %1026 = vmatpush1.bf16.msra.mxu1 %v1951_v57 }
  0xbc   :  { %945 = vmatprep.subr.bf16.mxu0 %v1956_v58  ;;  %1027 = vmatprep.subr.bf16.mxu1 %v1959_v59 }
  0xbf   :  { %946 = vmatpush1.bf16.msra.mxu0 %v1954_v60  ;;  %1028 = vmatpush1.bf16.msra.mxu1 %v1957_v61 }
  0xc0   :  { %947 = vmatprep.subr.bf16.mxu0 %v1962_v62  ;;  %1029 = vmatprep.subr.bf16.mxu1 %v1965_v63 }
  0xc3   :  { %948 = vmatpush1.bf16.msra.mxu0 %v1960_v0  ;;  %1030 = vmatpush1.bf16.msra.mxu1 %v1963_v1 }
  0xc4   :  { %949 = vmatprep.subr.bf16.mxu0 %v1968_v2  ;;  %1031 = vmatprep.subr.bf16.mxu1 %v1971_v3 }
  0xc7   :  { %950 = vmatpush1.bf16.msra.mxu0 %v1966_v4  ;;  %1032 = vmatpush1.bf16.msra.mxu1 %v1969_v5 }
  0xc8   :  { %1685 = vmatprep.subr.bf16.mxu0 %v1972_v7  ;;  %1707 = vmatprep.subr.bf16.mxu1 %v1973_v8 }
  0xca   :  { %952 = vmatmul.mubr.bf16.vlgmr.msra.gmra.mrb[0].mxu0 %v86_v9  ;;  %1034 = vmatmul.mubr.bf16.vlgmr.msra.gmra.mrb[0].mxu1 %v86_v9  ;;  %v2005_v9 = vld [vmem:[#allocation7 + $0x8] sm:$0xff]  }
  0xcb   :  { %1686 = vmatpush3.bf16.msra.mxu0 %v1974_v10  ;;  %1708 = vmatpush3.bf16.msra.mxu1 %v1975_v11  ;;  %v2006_v10 = vld [vmem:[#allocation7 + $0x10] sm:$0xff]   ;;  %v2007_v11 = vld [vmem:[#allocation7 + $0x18] sm:$0xff]  }
  0xcc   :  { %1687 = vmatprep.subr.bf16.mxu0 %v1976_v12  ;;  %1709 = vmatprep.subr.bf16.mxu1 %v1977_v13  ;;  %v2008_v12 = vld [vmem:[#allocation7 + $0x20] sm:$0xff]   ;;  %v2009_v13 = vld [vmem:[#allocation7 + $0x28] sm:$0xff]  }
  0xcf   :  { %1688 = vmatpush3.bf16.msra.mxu0 %v1978_v14  ;;  %1710 = vmatpush3.bf16.msra.mxu1 %v1979_v15  ;;  %v2010_v14 = vld [vmem:[#allocation7 + $0x30] sm:$0xff]   ;;  %v2011_v15 = vld [vmem:[#allocation7 + $0x38] sm:$0xff]  }
  0xd0   :  { %1689 = vmatprep.subr.bf16.mxu0 %v1980_v16  ;;  %1711 = vmatprep.subr.bf16.mxu1 %v1981_v17 }
  0xd3   :  { %1690 = vmatpush3.bf16.msra.mxu0 %v1982_v18  ;;  %1712 = vmatpush3.bf16.msra.mxu1 %v1983_v19  ;;  %v1643_v18 = vld [vmem:[%s2220_s4] ss:$0 sm:$0xff] }
  0xd4   :  { %1691 = vmatprep.subr.bf16.mxu0 %v1984_v20  ;;  %1713 = vmatprep.subr.bf16.mxu1 %v1985_v21 }
  0xd7   :  { %1692 = vmatpush3.bf16.msra.mxu0 %v1986_v22  ;;  %1714 = vmatpush3.bf16.msra.mxu1 %v1987_v23 }
  0xd8   :  { %1693 = vmatprep.subr.bf16.mxu0 %v1988_v24  ;;  %1715 = vmatprep.subr.bf16.mxu1 %v1989_v25 }
  0xdb   :  { %1694 = vmatpush3.bf16.msra.mxu0 %v1990_v26  ;;  %1716 = vmatpush3.bf16.msra.mxu1 %v1991_v27 }
  0xdc   :  { %1695 = vmatprep.subr.bf16.mxu0 %v1992_v28  ;;  %1717 = vmatprep.subr.bf16.mxu1 %v1993_v29 }
  0xdf   :  { %1696 = vmatpush3.bf16.msra.mxu0 %v1994_v30  ;;  %1718 = vmatpush3.bf16.msra.mxu1 %v1995_v31  ;;  %v1676_v31 = vld [vmem:[%s2222_s6] ss:$0 sm:$0xff] }
  0xe0   :  { %1697 = vmatprep.subr.bf16.mxu0 %v1996_v32  ;;  %1719 = vmatprep.subr.bf16.mxu1 %v1997_v33 }
  0xe3   :  { %1698 = vmatpush3.bf16.msra.mxu0 %v1998_v34  ;;  %1720 = vmatpush3.bf16.msra.mxu1 %v1999_v35 }
  0xe4   :  { %1699 = vmatprep.subr.bf16.mxu0 %v2000_v36  ;;  %1721 = vmatprep.subr.bf16.mxu1 %v2001_v37 }
  0xe7   :  { %1700 = vmatpush3.bf16.msra.mxu0 %v2002_v38  ;;  %1722 = vmatpush3.bf16.msra.mxu1 %v2003_v39 }
  0xe8   :  { %1738 = vmatprep.subr.bf16.mxu0 %v2114_v40 }
 0x19d   :  { %v953_v52 = vpop.f32.mrb[0].mxu0  ;;  %v1035_v53 = vpop.f32.mrb[0].mxu1 }
 0x19e   :  { %v1758_v54 = vadd.f32 %v953_v52, %v221_v48  ;;  %v1760_v55 = vadd.f32 %v1035_v53, %v229_v49  ;;  %v955_v56 = vpop.f32.mrb[1].mxu0  ;;  %v1037_v57 = vpop.f32.mrb[1].mxu1 }
 0x19f   :  { %v1759_v58 = vadd.f32 %v955_v56, %v225_v50  ;;  %v1761_v59 = vadd.f32 %v1037_v57, %v233_v51  ;;  %v957_v60 = vpop.f32.mrb[2].mxu0  ;;  %v1039_v61 = vpop.f32.mrb[2].mxu1 }
 0x1a0   :  { %v1042_v62 = vmax.f32 %v1758_v54, 0.0  ;;  %v1044_v63 = vmax.f32 %v1760_v55, 0.0  ;;  %v958_v0 = vpop.f32.mrb[3].mxu0  ;;  %v1040_v1 = vpop.f32.mrb[3].mxu1 }
 0x1a1   :  { %v1043_v2 = vmax.f32 %v1759_v58, 0.0  ;;  %v1045_v3 = vmax.f32 %v1761_v59, 0.0 }
 0x1a2   :  { %v1046_v7 = vpack.c.bf16 %v1042_v62, %v1042_v62  ;;  %v1048_v8 = vpack.c.bf16 %v1044_v63, %v1044_v63 }
 0x1a3   :  { %v1047_v4 = vpack.c.bf16 %v1043_v2, %v1043_v2  ;;  %v1049_v5 = vpack.c.bf16 %v1045_v3, %v1045_v3 }
 0x1a5   :  { %1345 = vmatprep.mubr.bf16.mxu0 %v1047_v4  ;;  %1385 = vmatprep.mubr.bf16.mxu1 %v1049_v5 }
 0x1a6   :  { %1346 = vmatmul.mubr.bf16.vlgmr.msra.gmra.mrb[4].mxu0 %v1046_v7  ;;  %1386 = vmatmul.mubr.bf16.vlgmr.msra.gmra.mrb[4].mxu1 %v1048_v8 }
 0x1a7   :  { %1739 = vmatpush3.bf16.msra.mxu0 %v2004_v6  ;;  %1754 = vmatprep.mubr.msk.bf16.mxu0 %vm2115_vm0, %v2114_v40 }
 0x1a8   :  { %1740 = vmatprep.subr.bf16.mxu0 %v2114_v40 }
 0x1ab   :  { %1741 = vmatpush3.bf16.msra.mxu0 %v2005_v9 }
 0x1ac   :  { %1742 = vmatprep.subr.bf16.mxu0 %v2114_v40 }
 0x1af   :  { %1743 = vmatpush3.bf16.msra.mxu0 %v2006_v10 }
 0x1b0   :  { %1744 = vmatprep.subr.bf16.mxu0 %v2114_v40 }
 0x1b3   :  { %1745 = vmatpush3.bf16.msra.mxu0 %v2007_v11 }
 0x1b4   :  { %1746 = vmatprep.subr.bf16.mxu0 %v2114_v40 }
 0x1b7   :  { %1747 = vmatpush3.bf16.msra.mxu0 %v2008_v12 }
 0x1b8   :  { %1748 = vmatprep.subr.bf16.mxu0 %v2114_v40 }
 0x1bb   :  { %1749 = vmatpush3.bf16.msra.mxu0 %v2009_v13 }
 0x1bc   :  { %1750 = vmatprep.subr.bf16.mxu0 %v2114_v40 }
 0x1bf   :  { %1751 = vmatpush3.bf16.msra.mxu0 %v2010_v14 }
 0x1c0   :  { %1752 = vmatprep.subr.bf16.mxu0 %v2114_v40 }
 0x1c3   :  { %1753 = vmatpush3.bf16.msra.mxu0 %v2011_v15 }
 0x279   :  { %v1701_v16 = vpop.f32.mrb[4].mxu0  ;;  %v1723_v17 = vpop.f32.mrb[4].mxu1 }
 0x27a   :  { %v1702_v19 = vpop.f32.mrb[5].mxu0  ;;  %v1724_v20 = vpop.f32.mrb[5].mxu1 }
 0x27b   :  { %v1703_v21 = vadd.f32 %v1702_v19, %v1701_v16  ;;  %v1725_v22 = vadd.f32 %v1724_v20, %v1723_v17  ;;  %v1704_v23 = vpop.f32.mrb[6].mxu0  ;;  %v1726_v24 = vpop.f32.mrb[6].mxu1 }
 0x27c   :  { %v1705_v25 = vpop.f32.mrb[7].mxu0  ;;  %v1727_v26 = vpop.f32.mrb[7].mxu1 }
 0x27d   :  { %v1348_v27 = vadd.f32 %v1703_v21, %v1643_v18 }
 0x27f   :  { %v1388_v28 = vadd.f32 %v1725_v22, %v1348_v27 }
 0x281   :  { %v1393_v29 = vmax.f32 %v1388_v28, 0.0 }
 0x283   :  { %v1394_v30 = vpack.c.bf16 %v1393_v29, %v1393_v29 }
 0x285   :  { %1755 = vmatmul.mubr.bf16.vlgmr.msra.gmra.mrb[8].mxu0 %v1394_v30 }
 0x358   :  { %v1500_v32 = vpop.f32.mrb[8].mxu0 }
 0x359   :  { %v1501_v33 = vadd.f32 %v1676_v31, %v1500_v32  ;;  %v1756_v34 = vpop.f32.mrb[9].mxu0 }
 0x35a   :  { %v1503_v35 = vpop.f32.mrb[10].mxu0 }
 0x35b   :  { %1507 = vst.msk [vmem:[%s2223_s7] sm:$0xff] %vm1506_vm1, %v1501_v33  ;;  %v1757_v36 = vpop.f32.mrb[11].mxu0 }
 0x35c   :  { %1512 = vsyncpa [#allocation3], 1 }
 0x35d   :  { %1513 = vsyncpa [#allocation5], 1 }
 0x35e   :  { %1514 = vsyncpa [#allocation8], 1 }

</bundles_post_ra>
